<compile_context>
chip_gen: v5e
topology: v5e:2x2
jax: 0.10.0
libtpu: 0.0.40
codegen_flags: <defaults>
</compile_context>

<pallas_src>
import functools

import jax
import jax.numpy as jnp
import numpy as np
from jax.experimental import pallas as pl
from jax.experimental.pallas import tpu as pltpu

_SMOOTH = 1e-5


def _round_up(x, m):
    return (x + m - 1) // m * m


def _round_down(x, m):
    return x // m * m


def _vmem_capacity_bytes():
    """Physical VMEM per core; conservative 64 MiB fallback (v7x-safe)."""
    try:
        cap = int(getattr(pltpu.get_tpu_info(), "vmem_capacity_bytes", 0))
        return cap if cap > 0 else 64 << 20
    except Exception:
        return 64 << 20


def _choose_tile_r(R, B, bytes_per_row, vmem_limit):
    """Largest multiple-of-8 row-tile of the (R, L) view that fits the VMEM budget."""
    if R <= 8:
        return R
    budget = int(0.6 * vmem_limit)                     # double-buffered input tiles
    max_rows = max(8, _round_down(budget // max(1, 2 * bytes_per_row), 8))
    want_blocks = 8 if B == 1 else 2                   # keep pipeline (and megacore) fed
    cap_rows = max(8, _round_up(pl.cdiv(R, want_blocks), 8))
    return max(8, min(max_rows, cap_rows, _round_down(R, 8)))


def _dice_partial_kernel(pred_ref, gt_ref, out_ref, *, num_class, n_q, chunk,
                         n_chunks, tile_r, total_rows, nr_s, need_row_mask, unroll):
    """Accumulate per-class intersection / union partial sums for one tile.

    pred_ref: (1, C, tile_r, L)  native-dtype logits
    gt_ref:   (1, 1, tile_r, L)  native-dtype labels in {0..C-1} (pad sentinel = C)
    out_ref:  (1, 1, 2C, L)      f32 accumulator, resident across the spatial axis
    """
    r = pl.program_id(2)
    lanes = gt_ref.shape[-1]

    @pl.when(r == 0)
    def _init():
        out_ref[...] = jnp.zeros_like(out_ref)

    if need_row_mask:
        block_row0 = (pl.program_id(1) * nr_s + r) * tile_r

    def process_chunk(base, accs):
        gt_c = gt_ref[0, 0, pl.ds(base, chunk), :]
        xs = [pred_ref[0, c, pl.ds(base, chunk), :].astype(jnp.float32)
              for c in range(num_class)]

        # Numerically stable softmax over the small, unrolled class axis.
        m = xs[0]
        for c in range(1, num_class):
            m = jnp.maximum(m, xs[c])
        es = [jnp.exp(x - m) for x in xs]
        denom = es[0]
        for c in range(1, num_class):
            denom = denom + es[c]
        # EUP approximate reciprocal + one Newton step (~f32 accuracy, off the VALU).
        inv = pl.reciprocal(denom, approx=True)
        inv = inv * (2.0 - denom * inv)

        if need_row_mask:
            rows_left = total_rows - (block_row0 + base)
            valid = jax.lax.broadcasted_iota(jnp.int32, (chunk, lanes), 0) < rows_left

        new = list(accs)
        for c in range(num_class):
            sp = es[c] * inv                           # softmax prob of class c
            onehot = gt_c == c                         # one-hot ground truth
            if need_row_mask:
                sp = jnp.where(valid, sp, 0.0)
                onehot = jnp.logical_and(valid, onehot)
            new[c] = accs[c] + jnp.where(onehot, sp, 0.0)                 # intersection
            new[num_class + c] = (accs[num_class + c] + sp
                                  + onehot.astype(jnp.float32))           # union
        return tuple(new)

    zero = jnp.zeros((chunk, lanes), jnp.float32)
    init = (zero,) * n_q
    if n_chunks == 1:
        accs = process_chunk(0, init)
    else:
        accs = jax.lax.fori_loop(
            0, n_chunks,
            lambda i, carry: process_chunk(pl.multiple_of(i * chunk, chunk), carry),
            init, unroll=unroll)

    # Per grid step: one sublane reduction per quantity, added into the resident
    # output block (lane reduction is finished in the wrapper).
    for q in range(n_q):
        row = jnp.sum(accs[q], axis=0, keepdims=True)                     # (1, L)
        out_ref[0, 0, pl.ds(q, 1), :] = out_ref[0, 0, pl.ds(q, 1), :] + row


def dice_loss(pred, gt):
    """pred: (B, C, H, W) float logits, gt: (B, 1, H, W) labels in {0..C-1}."""
    B, C, H, W = pred.shape
    assert gt.shape == (B, 1, H, W)
    n_q = 2 * C
    N = H * W

    # Lane-dense spatial view: flatten (H, W) -> (R, L) with L a multiple of 128.
    N_pad = _round_up(N, 128)
    L = 256 if N_pad % 256 == 0 else 128
    R = N_pad // L
    pad = N_pad - N

    pred_f = pred.reshape(B, C, N)
    gt_f = gt.reshape(B, 1, N)
    if pad:
        # TODO(synk): rare path (H*W not a multiple of 128) costs one HBM copy; padded
        # logits are 0 (softmax = 1/C, corrected exactly below), gt pad is sentinel C.
        pred_f = jnp.pad(pred_f, ((0, 0), (0, 0), (0, pad)))
        gt_f = jnp.pad(gt_f, ((0, 0), (0, 0), (0, pad)), constant_values=C)
    pred_v = pred_f.reshape(B, C, R, L)               # contiguous reshape: no HBM pass
    gt_v = gt_f.reshape(B, 1, R, L)

    pred_b = jnp.dtype(pred_v.dtype).itemsize
    gt_b = jnp.dtype(gt_v.dtype).itemsize

    vmem_cap = _vmem_capacity_bytes()
    vmem_limit = max(32 << 20, min(int(0.75 * vmem_cap), 96 << 20))
    bytes_per_row = (C * pred_b + gt_b) * L
    tile_r = _choose_tile_r(R, B, bytes_per_row, vmem_limit)
    nr = pl.cdiv(R, tile_r)

    # Optional 2-way spatial split so both v7x TensorCores are busy when B == 1
    # (harmless on single-TC v5e/v6e).
    split = 2 if (B == 1 and nr >= 2 and nr % 2 == 0) else 1
    nr_s = nr // split

    chunk = tile_r if tile_r < 8 else 8               # vreg-height inner chunks
    n_chunks = max(1, tile_r // chunk)
    unroll = 1
    for u in (8, 4, 2):
        if n_chunks >= u and n_chunks % u == 0:
            unroll = u
            break
    need_row_mask = (R % tile_r) != 0

    cost = pl.CostEstimate(
        flops=int(14 * C * B * N_pad),
        transcendentals=int((C + 1) * B * N_pad),
        bytes_accessed=int(B * N_pad * (C * pred_b + gt_b) + B * split * n_q * L * 4),
    )

    kernel = functools.partial(
        _dice_partial_kernel, num_class=C, n_q=n_q, chunk=chunk, n_chunks=n_chunks,
        tile_r=tile_r, total_rows=R, nr_s=nr_s, need_row_mask=need_row_mask,
        unroll=unroll)

    partials = pl.pallas_call(
        kernel,
        out_shape=jax.ShapeDtypeStruct((B, split, n_q, L), jnp.float32),
        grid=(B, split, nr_s),
        in_specs=[
            pl.BlockSpec((1, C, tile_r, L), lambda b, s, r: (b, 0, s * nr_s + r, 0)),
            pl.BlockSpec((1, 1, tile_r, L), lambda b, s, r: (b, 0, s * nr_s + r, 0)),
        ],
        out_specs=pl.BlockSpec((1, 1, n_q, L), lambda b, s, r: (b, s, 0, 0)),
        compiler_params=pltpu.CompilerParams(
            dimension_semantics=("parallel", "parallel", "arbitrary"),
            vmem_limit_bytes=vmem_limit),
        cost_estimate=cost,
    )(pred_v, gt_v)

    sums = jnp.sum(partials, axis=(0, 1, 3))          # (2C,) over batch, split, lanes
    inter = sums[:C]
    union = sums[C:]
    if pad:
        # Padded pixels: zero logits -> softmax 1/C per class; sentinel gt never
        # matches, so only the z_sum part of each union needs an exact correction.
        union = union - jnp.float32(B * pad) / C
    dice = (2.0 * inter + _SMOOTH) / (union + _SMOOTH)
    return 1.0 - jnp.sum(dice) / C


def dice_loss_ref(pred, gt):
    """Pure-JAX reference mirroring the PyTorch forward."""
    sp = jax.nn.softmax(pred.astype(jnp.float32), axis=1)      # (B, C, H, W)
    gt_sq = gt.reshape(gt.shape[0], gt.shape[2], gt.shape[3])  # (B, H, W)
    num_class = pred.shape[1]
    loss = 0.0
    for c in range(num_class):
        lab = (gt_sq == c).astype(jnp.float32)
        intersect = jnp.sum(sp[:, c] * lab)
        z_sum = jnp.sum(sp[:, c])
        y_sum = jnp.sum(lab)
        loss = loss + (2.0 * intersect + _SMOOTH) / (z_sum + y_sum + _SMOOTH)
    return 1.0 - loss / num_class


if __name__ == "__main__":
    key = jax.random.PRNGKey(0)

    # (B, C, H, W) configs: basic / lane-pad path / row-mask + split path / inner-loop path.
    configs = [(2, 3, 16, 16), (2, 3, 10, 10), (1, 3, 48, 48), (1, 3, 192, 192)]
    for B, C, H, W in configs:
        key, k_pred, k_gt = jax.random.split(key, 3)
        pred = jax.random.normal(k_pred, (B, C, H, W), dtype=jnp.float32)
        # gt emulates a float label map with classes {0, 1, 2}, shape (B, 1, H, W).
        # NOTE: labels must be exactly-representable integers (matches the PyTorch
        # reference, which also relies on exact gt == k comparisons).
        gt = jax.random.randint(k_gt, (B, 1, H, W), 0, C).astype(jnp.float32)

        loss = jax.block_until_ready(dice_loss(pred, gt))
        loss_ref = jax.block_until_ready(dice_loss_ref(pred, gt))
        np.testing.assert_allclose(np.asarray(loss), np.asarray(loss_ref),
                                   rtol=1e-4, atol=1e-4)

    print("KERNEL_OK")
</pallas_src>

<mosaic_0001>
module attributes {stable_mosaic.version = 11 : i64} {
  func.func @_dice_partial_kernel(%arg0: i32, %arg1: i32, %arg2: i32, %arg3: memref<1x3x1x256xf32, #tpu.memory_space<vmem>>, %arg4: memref<1x1x1x256xf32, #tpu.memory_space<vmem>>, %arg5: memref<1x1x6x256xf32, #tpu.memory_space<vmem>>) attributes {dimension_semantics = [#tpu.dimension_semantics<parallel>, #tpu.dimension_semantics<parallel>, #tpu.dimension_semantics<arbitrary>], iteration_bounds = array<i64: 2, 1, 1>, scalar_prefetch = 0 : i64, scratch_operands = 0 : i64, tpu.core_type = #tpu.core_type<tc>, window_params = [{transform_indices = @transform_0, window_bounds = array<i64: 1, 3, 1, 256>}, {transform_indices = @transform_1, window_bounds = array<i64: 1, 1, 1, 256>}, {transform_indices = @transform_2, window_bounds = array<i64: 1, 1, 6, 256>}]} {
    %c0_i32 = arith.constant 0 : i32
    %0 = arith.cmpi eq, %arg2, %c0_i32 : i32
    %1 = arith.extui %0 : i1 to i32
    %c0_i32_0 = arith.constant 0 : i32
    %2 = arith.cmpi ne, %1, %c0_i32_0 : i32
    scf.if %2 {
      %cst_72 = arith.constant 0.000000e+00 : f32
      %105 = vector.broadcast %cst_72 : f32 to vector<1x1x6x256xf32>
      %c0_73 = arith.constant 0 : index
      %c0_74 = arith.constant 0 : index
      %c0_75 = arith.constant 0 : index
      %c0_76 = arith.constant 0 : index
      %106 = vector.load %arg5[%c0_73, %c0_74, %c0_75, %c0_76] : memref<1x1x6x256xf32, #tpu.memory_space<vmem>>, vector<1x1x6x256xf32>
      tpu.vector_store %arg5[%c0_73, %c0_74, %c0_75, %c0_76], %105 {strides = array<i32>} : memref<1x1x6x256xf32, #tpu.memory_space<vmem>>, vector<1x1x6x256xf32>,
    } else {
    }
    %cst = arith.constant 0.000000e+00 : f32
    %3 = vector.broadcast %cst : f32 to vector<1x256xf32>
    %c0 = arith.constant 0 : index
    %c0_1 = arith.constant 0 : index
    %c0_2 = arith.constant 0 : index
    %c0_3 = arith.constant 0 : index
    %4 = vector.load %arg4[%c0, %c0_1, %c0_2, %c0_3] : memref<1x1x1x256xf32, #tpu.memory_space<vmem>>, vector<1x1x1x256xf32>
    %5 = vector.shape_cast %4 : vector<1x1x1x256xf32> to vector<1x256xf32>
    %c0_4 = arith.constant 0 : index
    %c0_5 = arith.constant 0 : index
    %c0_6 = arith.constant 0 : index
    %c0_7 = arith.constant 0 : index
    %6 = vector.load %arg3[%c0_4, %c0_5, %c0_6, %c0_7] : memref<1x3x1x256xf32, #tpu.memory_space<vmem>>, vector<1x1x1x256xf32>
    %7 = vector.shape_cast %6 : vector<1x1x1x256xf32> to vector<1x256xf32>
    %c0_8 = arith.constant 0 : index
    %c1 = arith.constant 1 : index
    %c0_9 = arith.constant 0 : index
    %c0_10 = arith.constant 0 : index
    %8 = vector.load %arg3[%c0_8, %c1, %c0_9, %c0_10] : memref<1x3x1x256xf32, #tpu.memory_space<vmem>>, vector<1x1x1x256xf32>
    %9 = vector.shape_cast %8 : vector<1x1x1x256xf32> to vector<1x256xf32>
    %c0_11 = arith.constant 0 : index
    %c2 = arith.constant 2 : index
    %c0_12 = arith.constant 0 : index
    %c0_13 = arith.constant 0 : index
    %10 = vector.load %arg3[%c0_11, %c2, %c0_12, %c0_13] : memref<1x3x1x256xf32, #tpu.memory_space<vmem>>, vector<1x1x1x256xf32>
    %11 = vector.shape_cast %10 : vector<1x1x1x256xf32> to vector<1x256xf32>
    %12 = arith.maximumf %7, %9 : vector<1x256xf32>
    %13 = arith.maximumf %12, %11 : vector<1x256xf32>
    %14 = arith.subf %7, %13 : vector<1x256xf32>
    %15 = math.exp %14 : vector<1x256xf32>
    %16 = arith.subf %9, %13 : vector<1x256xf32>
    %17 = math.exp %16 : vector<1x256xf32>
    %18 = arith.subf %11, %13 : vector<1x256xf32>
    %19 = math.exp %18 : vector<1x256xf32>
    %20 = arith.addf %15, %17 : vector<1x256xf32>
    %21 = arith.addf %20, %19 : vector<1x256xf32>
    %22 = tpu.reciprocal %21 {approx = true} : vector<1x256xf32> -> vector<1x256xf32>
    %23 = arith.mulf %21, %22 : vector<1x256xf32>
    %cst_14 = arith.constant 2.000000e+00 : f32
    %24 = vector.broadcast %cst_14 : f32 to vector<1x256xf32>
    %25 = arith.subf %24, %23 : vector<1x256xf32>
    %26 = arith.mulf %22, %25 : vector<1x256xf32>
    %27 = arith.mulf %15, %26 : vector<1x256xf32>
    %cst_15 = arith.constant 0.000000e+00 : f32
    %28 = vector.broadcast %cst_15 : f32 to vector<1x256xf32>
    %29 = arith.cmpf oeq, %5, %28 : vector<1x256xf32>
    %cst_16 = arith.constant 0.000000e+00 : f32
    %30 = vector.broadcast %cst_16 : f32 to vector<1x256xf32>
    %31 = arith.select %29, %27, %30 : vector<1x256xi1>, vector<1x256xf32>
    %32 = arith.addf %3, %31 : vector<1x256xf32>
    %33 = arith.addf %3, %27 : vector<1x256xf32>
    %34 = arith.extui %29 : vector<1x256xi1> to vector<1x256xi32>
    %35 = arith.sitofp %34 : vector<1x256xi32> to vector<1x256xf32>
    %36 = arith.addf %33, %35 : vector<1x256xf32>
    %37 = arith.mulf %17, %26 : vector<1x256xf32>
    %cst_17 = arith.constant 1.000000e+00 : f32
    %38 = vector.broadcast %cst_17 : f32 to vector<1x256xf32>
    %39 = arith.cmpf oeq, %5, %38 : vector<1x256xf32>
    %cst_18 = arith.constant 0.000000e+00 : f32
    %40 = vector.broadcast %cst_18 : f32 to vector<1x256xf32>
    %41 = arith.select %39, %37, %40 : vector<1x256xi1>, vector<1x256xf32>
    %42 = arith.addf %3, %41 : vector<1x256xf32>
    %43 = arith.addf %3, %37 : vector<1x256xf32>
    %44 = arith.extui %39 : vector<1x256xi1> to vector<1x256xi32>
    %45 = arith.sitofp %44 : vector<1x256xi32> to vector<1x256xf32>
    %46 = arith.addf %43, %45 : vector<1x256xf32>
    %47 = arith.mulf %19, %26 : vector<1x256xf32>
    %cst_19 = arith.constant 2.000000e+00 : f32
    %48 = vector.broadcast %cst_19 : f32 to vector<1x256xf32>
    %49 = arith.cmpf oeq, %5, %48 : vector<1x256xf32>
    %cst_20 = arith.constant 0.000000e+00 : f32
    %50 = vector.broadcast %cst_20 : f32 to vector<1x256xf32>
    %51 = arith.select %49, %47, %50 : vector<1x256xi1>, vector<1x256xf32>
    %52 = arith.addf %3, %51 : vector<1x256xf32>
    %53 = arith.addf %3, %47 : vector<1x256xf32>
    %54 = arith.extui %49 : vector<1x256xi1> to vector<1x256xi32>
    %55 = arith.sitofp %54 : vector<1x256xi32> to vector<1x256xf32>
    %56 = arith.addf %53, %55 : vector<1x256xf32>
    %cst_21 = arith.constant dense<0.000000e+00> : vector<256xf32>
    %57 = vector.multi_reduction <add>, %32, %cst_21 [0] : vector<1x256xf32> to vector<256xf32>
    %58 = vector.shape_cast %57 : vector<256xf32> to vector<1x256xf32>
    %c0_22 = arith.constant 0 : index
    %c0_23 = arith.constant 0 : index
    %c0_24 = arith.constant 0 : index
    %c0_25 = arith.constant 0 : index
    %59 = vector.load %arg5[%c0_22, %c0_23, %c0_24, %c0_25] : memref<1x1x6x256xf32, #tpu.memory_space<vmem>>, vector<1x1x1x256xf32>
    %60 = vector.shape_cast %59 : vector<1x1x1x256xf32> to vector<1x256xf32>
    %61 = arith.addf %60, %58 : vector<1x256xf32>
    %c0_26 = arith.constant 0 : index
    %c0_27 = arith.constant 0 : index
    %c0_28 = arith.constant 0 : index
    %c0_29 = arith.constant 0 : index
    %62 = vector.load %arg5[%c0_26, %c0_27, %c0_28, %c0_29] : memref<1x1x6x256xf32, #tpu.memory_space<vmem>>, vector<1x1x1x256xf32>
    %63 = vector.shape_cast %62 : vector<1x1x1x256xf32> to vector<1x256xf32>
    %64 = vector.shape_cast %61 : vector<1x256xf32> to vector<1x1x1x256xf32>
    tpu.vector_store %arg5[%c0_26, %c0_27, %c0_28, %c0_29], %64 {strides = array<i32>} : memref<1x1x6x256xf32, #tpu.memory_space<vmem>>, vector<1x1x1x256xf32>,
    %cst_30 = arith.constant dense<0.000000e+00> : vector<256xf32>
    %65 = vector.multi_reduction <add>, %42, %cst_30 [0] : vector<1x256xf32> to vector<256xf32>
    %66 = vector.shape_cast %65 : vector<256xf32> to vector<1x256xf32>
    %c0_31 = arith.constant 0 : index
    %c0_32 = arith.constant 0 : index
    %c1_33 = arith.constant 1 : index
    %c0_34 = arith.constant 0 : index
    %67 = vector.load %arg5[%c0_31, %c0_32, %c1_33, %c0_34] : memref<1x1x6x256xf32, #tpu.memory_space<vmem>>, vector<1x1x1x256xf32>
    %68 = vector.shape_cast %67 : vector<1x1x1x256xf32> to vector<1x256xf32>
    %69 = arith.addf %68, %66 : vector<1x256xf32>
    %c0_35 = arith.constant 0 : index
    %c0_36 = arith.constant 0 : index
    %c1_37 = arith.constant 1 : index
    %c0_38 = arith.constant 0 : index
    %70 = vector.load %arg5[%c0_35, %c0_36, %c1_37, %c0_38] : memref<1x1x6x256xf32, #tpu.memory_space<vmem>>, vector<1x1x1x256xf32>
    %71 = vector.shape_cast %70 : vector<1x1x1x256xf32> to vector<1x256xf32>
    %72 = vector.shape_cast %69 : vector<1x256xf32> to vector<1x1x1x256xf32>
    tpu.vector_store %arg5[%c0_35, %c0_36, %c1_37, %c0_38], %72 {strides = array<i32>} : memref<1x1x6x256xf32, #tpu.memory_space<vmem>>, vector<1x1x1x256xf32>,
    %cst_39 = arith.constant dense<0.000000e+00> : vector<256xf32>
    %73 = vector.multi_reduction <add>, %52, %cst_39 [0] : vector<1x256xf32> to vector<256xf32>
    %74 = vector.shape_cast %73 : vector<256xf32> to vector<1x256xf32>
    %c0_40 = arith.constant 0 : index
    %c0_41 = arith.constant 0 : index
    %c2_42 = arith.constant 2 : index
    %c0_43 = arith.constant 0 : index
    %75 = vector.load %arg5[%c0_40, %c0_41, %c2_42, %c0_43] : memref<1x1x6x256xf32, #tpu.memory_space<vmem>>, vector<1x1x1x256xf32>
    %76 = vector.shape_cast %75 : vector<1x1x1x256xf32> to vector<1x256xf32>
    %77 = arith.addf %76, %74 : vector<1x256xf32>
    %c0_44 = arith.constant 0 : index
    %c0_45 = arith.constant 0 : index
    %c2_46 = arith.constant 2 : index
    %c0_47 = arith.constant 0 : index
    %78 = vector.load %arg5[%c0_44, %c0_45, %c2_46, %c0_47] : memref<1x1x6x256xf32, #tpu.memory_space<vmem>>, vector<1x1x1x256xf32>
    %79 = vector.shape_cast %78 : vector<1x1x1x256xf32> to vector<1x256xf32>
    %80 = vector.shape_cast %77 : vector<1x256xf32> to vector<1x1x1x256xf32>
    tpu.vector_store %arg5[%c0_44, %c0_45, %c2_46, %c0_47], %80 {strides = array<i32>} : memref<1x1x6x256xf32, #tpu.memory_space<vmem>>, vector<1x1x1x256xf32>,
    %cst_48 = arith.constant dense<0.000000e+00> : vector<256xf32>
    %81 = vector.multi_reduction <add>, %36, %cst_48 [0] : vector<1x256xf32> to vector<256xf32>
    %82 = vector.shape_cast %81 : vector<256xf32> to vector<1x256xf32>
    %c0_49 = arith.constant 0 : index
    %c0_50 = arith.constant 0 : index
    %c3 = arith.constant 3 : index
    %c0_51 = arith.constant 0 : index
    %83 = vector.load %arg5[%c0_49, %c0_50, %c3, %c0_51] : memref<1x1x6x256xf32, #tpu.memory_space<vmem>>, vector<1x1x1x256xf32>
    %84 = vector.shape_cast %83 : vector<1x1x1x256xf32> to vector<1x256xf32>
    %85 = arith.addf %84, %82 : vector<1x256xf32>
    %c0_52 = arith.constant 0 : index
    %c0_53 = arith.constant 0 : index
    %c3_54 = arith.constant 3 : index
    %c0_55 = arith.constant 0 : index
    %86 = vector.load %arg5[%c0_52, %c0_53, %c3_54, %c0_55] : memref<1x1x6x256xf32, #tpu.memory_space<vmem>>, vector<1x1x1x256xf32>
    %87 = vector.shape_cast %86 : vector<1x1x1x256xf32> to vector<1x256xf32>
    %88 = vector.shape_cast %85 : vector<1x256xf32> to vector<1x1x1x256xf32>
    tpu.vector_store %arg5[%c0_52, %c0_53, %c3_54, %c0_55], %88 {strides = array<i32>} : memref<1x1x6x256xf32, #tpu.memory_space<vmem>>, vector<1x1x1x256xf32>,
    %cst_56 = arith.constant dense<0.000000e+00> : vector<256xf32>
    %89 = vector.multi_reduction <add>, %46, %cst_56 [0] : vector<1x256xf32> to vector<256xf32>
    %90 = vector.shape_cast %89 : vector<256xf32> to vector<1x256xf32>
    %c0_57 = arith.constant 0 : index
    %c0_58 = arith.constant 0 : index
    %c4 = arith.constant 4 : index
    %c0_59 = arith.constant 0 : index
    %91 = vector.load %arg5[%c0_57, %c0_58, %c4, %c0_59] : memref<1x1x6x256xf32, #tpu.memory_space<vmem>>, vector<1x1x1x256xf32>
    %92 = vector.shape_cast %91 : vector<1x1x1x256xf32> to vector<1x256xf32>
    %93 = arith.addf %92, %90 : vector<1x256xf32>
    %c0_60 = arith.constant 0 : index
    %c0_61 = arith.constant 0 : index
    %c4_62 = arith.constant 4 : index
    %c0_63 = arith.constant 0 : index
    %94 = vector.load %arg5[%c0_60, %c0_61, %c4_62, %c0_63] : memref<1x1x6x256xf32, #tpu.memory_space<vmem>>, vector<1x1x1x256xf32>
    %95 = vector.shape_cast %94 : vector<1x1x1x256xf32> to vector<1x256xf32>
    %96 = vector.shape_cast %93 : vector<1x256xf32> to vector<1x1x1x256xf32>
    tpu.vector_store %arg5[%c0_60, %c0_61, %c4_62, %c0_63], %96 {strides = array<i32>} : memref<1x1x6x256xf32, #tpu.memory_space<vmem>>, vector<1x1x1x256xf32>,
    %cst_64 = arith.constant dense<0.000000e+00> : vector<256xf32>
    %97 = vector.multi_reduction <add>, %56, %cst_64 [0] : vector<1x256xf32> to vector<256xf32>
    %98 = vector.shape_cast %97 : vector<256xf32> to vector<1x256xf32>
    %c0_65 = arith.constant 0 : index
    %c0_66 = arith.constant 0 : index
    %c5 = arith.constant 5 : index
    %c0_67 = arith.constant 0 : index
    %99 = vector.load %arg5[%c0_65, %c0_66, %c5, %c0_67] : memref<1x1x6x256xf32, #tpu.memory_space<vmem>>, vector<1x1x1x256xf32>
    %100 = vector.shape_cast %99 : vector<1x1x1x256xf32> to vector<1x256xf32>
    %101 = arith.addf %100, %98 : vector<1x256xf32>
    %c0_68 = arith.constant 0 : index
    %c0_69 = arith.constant 0 : index
    %c5_70 = arith.constant 5 : index
    %c0_71 = arith.constant 0 : index
    %102 = vector.load %arg5[%c0_68, %c0_69, %c5_70, %c0_71] : memref<1x1x6x256xf32, #tpu.memory_space<vmem>>, vector<1x1x1x256xf32>
    %103 = vector.shape_cast %102 : vector<1x1x1x256xf32> to vector<1x256xf32>
    %104 = vector.shape_cast %101 : vector<1x256xf32> to vector<1x1x1x256xf32>
    tpu.vector_store %arg5[%c0_68, %c0_69, %c5_70, %c0_71], %104 {strides = array<i32>} : memref<1x1x6x256xf32, #tpu.memory_space<vmem>>, vector<1x1x1x256xf32>,
    return
  }
  func.func @transform_0(%arg0: i32, %arg1: i32, %arg2: i32) -> (i32, i32, i32, i32) {
    %c1_i32 = arith.constant 1 : i32
    %0 = arith.muli %arg1, %c1_i32 : i32
    %1 = arith.addi %0, %arg2 : i32
    %c0_i32 = arith.constant 0 : i32
    %c0_i32_0 = arith.constant 0 : i32
    %c0_i32_1 = arith.constant 0 : i32
    return %arg0, %c0_i32, %1, %c0_i32_0 : i32, i32, i32, i32
  }
  func.func @transform_1(%arg0: i32, %arg1: i32, %arg2: i32) -> (i32, i32, i32, i32) {
    %c1_i32 = arith.constant 1 : i32
    %0 = arith.muli %arg1, %c1_i32 : i32
    %1 = arith.addi %0, %arg2 : i32
    %c0_i32 = arith.constant 0 : i32
    %c0_i32_0 = arith.constant 0 : i32
    %c0_i32_1 = arith.constant 0 : i32
    return %arg0, %c0_i32, %1, %c0_i32_0 : i32, i32, i32, i32
  }
  func.func @transform_2(%arg0: i32, %arg1: i32, %arg2: i32) -> (i32, i32, i32, i32) {
    %c0_i32 = arith.constant 0 : i32
    %c0_i32_0 = arith.constant 0 : i32
    %c0_i32_1 = arith.constant 0 : i32
    return %arg0, %arg1, %c0_i32, %c0_i32_0 : i32, i32, i32, i32
  }
}

</mosaic_0001>

<bundles_post_ra>
// kernel: tpu_custom_call.1
= control target key start
LH: loop header
LB: loop body
LE: loop exit
PB: predicated region body
PF: predicated region fallthrough
CT: control target
= control target key end

     0   :  { %7 = vsyncpa [#allocation3], 0  ;;  %s840_s0 = inlined_call_operand.hbm [shape: f32[2,3,1,256], index: 0, kind: input, shape index: {}]   ;;  %s841_s1 = inlined_call_operand.hbm [shape: f32[2,1,1,256], index: 1, kind: input, shape index: {}]   ;;  %s842_s2 = inlined_call_operand.vmem [shape: f32[2,1,6,256], index: 2, kind: output, shape index: {}]  }
   0x1   :  { %9 = vsyncpa [#allocation3 + $0x1], 0 }
   0x2   :  { %10 = vsyncpa [#allocation5], 0 }
   0x3   :  { %12 = vsyncpa [#allocation5 + $0x1], 0  ;;  %s704_s9 = smov 0   ;;  %s706_s10 = smov 0  }
   0x4   :  { %s708_s11 = smov 0   ;;  %s710_s12 = smov 0  }
   0x5   :  { %s712_s13 = smov 0   ;;  %s714_s14 = smov 0  }
   0x6 LB: > { %s468_s15 = sadd.s32 4294967295, %s684_s14   ;;  %s37_s16 = sadd.s32 1, %s680_s13  ;;  %s684_s14 = sphi %s714_s14, %s18_s14   ;;  %s680_s13 = sphi %s712_s13, %s851_s13   ;;  %s676_s12 = sphi %s710_s12, %s850_s12   ;;  %s672_s11 = sphi %s708_s11, %s849_s11   ;;  %s668_s10 = sphi %s706_s10, %s848_s10   ;;  %s664_s9 = sphi %s704_s9, %s847_s9  }
   0x7   : > { %p39_p0 = scmp.ge.s32.totalorder %s37_s16, 2  ;;  %s48_s17 = sadd.s32 1, %s672_s11 }
   0x8   : > { %p55_p1 = scmp.ne.s32.totalorder %s672_s11, %s668_s10  ;;  %p56_p2 = scmp.eq.s32.totalorder %s684_s14, 0 }
   0x9   : > { %s853_s16 = smov (%p39_p0, %s37_s16), 0  ;;  %p61_p4 = scmp.ne.s32.totalorder %s668_s10, %s664_s9 }
   0xa   : > { %p57_p3 = por %p56_p2, %p55_p1  ;;  %s43_s18 = ssub.s32 %s680_s13, %s853_s16 }
   0xb   : > { %p62_p5 = scmp.eq.s32.totalorder %s468_s15, 0  ;;  %p46_p6 = scmp.eq.s32.totalorder %s43_s18, 0 }
   0xc   : > { %p510_p8 = scmp.lt.s32.totalorder %s684_s14, 2  ;;  %s143_s21 = sand.u32 1, %s672_s11  }
   0xd   : > { %p743_p7 = por %p62_p5, %p61_p4  ;;  %s497_s22 = smul.u32 6, %s680_s13 }
   0xe   : > { %s749_s20 = scalar_select %p46_p6, %s672_s11, %s48_s17  }
   0xf   : > { %s496_s23 = smul.u32 6, %s143_s21  ;;  %s154_s26 = scalar_lea.hbm %s840_s0, %s497_s22 }
  0x10   : > { %p756_p9 = pnand %p510_p8, %p57_p3  ;;  %s155_s28 = sshll.u32 %s154_s26, 4  ;;  %s156_s28 = int_to_ptr.hbm [resolvable:$true] %s155_s28 }
  0x11   : > { %s147_s29 = scalar_lea.vmem [#allocation2], %s496_s23  ;;  %s144_s3 = scalar_lea.sflag [#allocation3], %s143_s21 }
  0x12   : > { %s157_s30 = sshll.u32 %s147_s29, 4  ;;  %s686_s4 = smov 32   ;;  %s158_s30 = int_to_ptr.vmem [resolvable:$true] %s157_s30 }
  0x13   : > { %s687_s5 = smov 2   ;;  %p474_p10 = scmp.ge.s32.totalorder %s684_s14, 1 }
  0x14   : > { %506 = dma.hbm_to_vmem [thread:$0]  (!%p756_p9), %s156_s28, 96, %s158_s30, %s144_s3, %s686_s4, %s686_s4, %s687_s5  }
  0x15   : > { %p187_p11 = scmp.lt.s32.totalorder %s684_s14, 3  ;;  %s472_s6 = sshll.u32 %s143_s21, 1 }
  0x16   : > { %s473_s7 = sshll.u32 %s680_s13, 1  ;;  %s171_s8 = scalar_lea.vmem [#allocation4], %s472_s6 }
  0x17   : > { %p188_p12 = pnand %p474_p10, %p187_p11  ;;  %s182_s9 = sshll.u32 %s171_s8, 4  ;;  %s183_s9 = int_to_ptr.vmem [resolvable:$true] %s182_s9 }
  0x18   : > { %s178_s18 = scalar_lea.hbm %s841_s1, %s473_s7  ;;  %s168_s23 = scalar_lea.sflag [#allocation5], %s143_s21 }
  0x19   : > { %s180_s22 = sshll.u32 %s178_s18, 4  ;;  %191 = sbr.rel (%p188_p12) target bundleno = 81 (0x51), region = 28  ;;  %s181_s22 = int_to_ptr.hbm [resolvable:$true] %s180_s22 }
  0x1a   : > { %509 = dma.hbm_to_vmem [thread:$0]  (!%p756_p9), %s181_s22, 32, %s183_s9, %s168_s23  }
  0x1b   : > { %s193_s24 = sand.u32 (!%p188_p12), 1, %s668_s10  }
  0x1c   : > { %s498_s25 = smul.u32 (!%p188_p12), 6, %s193_s24  ;;  %s194_s26 = scalar_lea.sflag (!%p188_p12), [#allocation3], %s193_s24 }
  0x1e   : > { %s197_s28 = scalar_lea.vmem [#allocation2], %s498_s25 }
  0x1f   : > { %655 = dma.done.wait (%p743_p7), %s194_s26, 96  }
  0x20   : > { %657 = vsyncadd (%p743_p7), %s194_s26, 4294967200  ;;  %s475_s29 = sshll.u32 %s193_s24, 1  ;;  %s204_s30 = scalar_lea.sflag [#allocation5], %s193_s24 }
  0x21   : > { %s207_s3 = scalar_lea.vmem [#allocation4], %s475_s29 }
  0x22   : > { %659 = dma.done.wait (%p743_p7), %s204_s30, 32  }
  0x23   : > { %661 = vsyncadd (%p743_p7), %s204_s30, 4294967264  ;;  %p240_p13 = scmp.lt.s32.totalorder %s676_s12, 1  ;;  %v688_v0 = vmov 0.0   ;;  %v256_v1 = vld [vmem:[%s197_s28] sm:$0x3]  ;;  %v305_v21 = vlaneseq }
  0x24   : > { %v478_v2 = vld [vmem:[%s197_s28 + $0x2] sm:$0x3]  ;;  %v479_v3 = vld [vmem:[%s197_s28 + $0x4] sm:$0x3]  ;;  %v255_v17 = vld [vmem:[%s207_s3] sm:$0x3] }
  0x25   : > { %s855_s12 = smov (!%p240_p13, %s676_s12), 1  ;;  %v261_v4 = vmax.f32 %v256_v1, %v478_v2  ;;  %vm279_vm0 = vcmp.eq.f32.partialorder %v255_v17, 0.0  ;;  %vm287_vm1 = vcmp.eq.f32.partialorder %v255_v17, 1.0  ;;  %vm295_vm2 = vcmp.eq.f32.partialorder %v255_v17, 2.0 }
  0x26   : > { %s495_s21 = sshll.u32 %s855_s12, 4  ;;  %v480_v23 = vsel %vm279_vm0, 1.0, %v688_v0  ;;  %v481_v24 = vsel %vm287_vm1, 1.0, %v688_v0  ;;  %v482_v25 = vsel %vm295_vm2, 1.0, %v688_v0  ;;  %vm792_vm3 = vcmp.lt.s32.totalorder %v305_v21, 256 }
  0x27   : > { %s784_s5 = scalar_lea.vmem %s842_s2, %s495_s21  ;;  %v262_v5 = vmax.f32 %v261_v4, %v479_v3 }
  0x28   : > { %253 = vst [vmem:[%s784_s5] sm:$0x3f] %v688_v0 }
  0x29   : > { %254 = vst [vmem:[%s784_s5 + $0x8] sm:$0x3f] %v688_v0  ;;  %v263_v6 = vsub.f32 %v256_v1, %v262_v5  ;;  %v266_v7 = vsub.f32 %v478_v2, %v262_v5  ;;  %v269_v8 = vsub.f32 %v479_v3, %v262_v5 }
  0x2b   : > { %v264_v9 = vmul.f32 1.442695, %v263_v6  ;;  %v267_v10 = vmul.f32 1.442695, %v266_v7  ;;  %v270_v11 = vmul.f32 1.442695, %v269_v8 }
  0x2d   : > { %562 = vpow2.f32 %v264_v9 }
  0x2e   : > { %564 = vpow2.f32 %v267_v10 }
  0x2f   : > { %566 = vpow2.f32 %v270_v11 }
  0x30   : > { %v303_v26 = vld [vmem:[%s784_s5] ss:$8 sm:$0x3]  ;;  %v483_v31 = vld [vmem:[%s784_s5 + $0x1] ss:$8 sm:$0x3] }
  0x31   : > { %v485_v32 = vld [vmem:[%s784_s5 + $0x2] ss:$8 sm:$0x3]  ;;  %v487_v33 = vld [vmem:[%s784_s5 + $0x3] ss:$8 sm:$0x3] }
  0x32   : > { %v489_v38 = vld [vmem:[%s784_s5 + $0x4] ss:$8 sm:$0x3]  ;;  %v491_v42 = vld [vmem:[%s784_s5 + $0x5] ss:$8 sm:$0x3] }
  0x33   : > { %v563_v12 = vpop.eup %562 }
  0x34   : > { %v565_v13 = vpop.eup %564 }
  0x35   : > { %v567_v14 = vpop.eup %566  ;;  %v272_v15 = vadd.f32 %v565_v13, %v563_v12 }
  0x37   : > { %v273_v16 = vadd.f32 %v567_v14, %v272_v15 }
  0x39   : > { %568 = vrcp.f32 %v273_v16 }
  0x3f   : > { %v569_v18 = vpop.eup %568 }
  0x40   : > { %v275_v19 = vmul.f32 %v569_v18, %v273_v16 }
  0x42   : > { %v276_v20 = vsub.f32 2.0, %v275_v19 }
  0x44   : > { %v277_v22 = vmul.f32 %v569_v18, %v276_v20 }
  0x46   : > { %v278_v27 = vmul.f32 %v563_v12, %v277_v22  ;;  %v286_v28 = vmul.f32 %v565_v13, %v277_v22  ;;  %v294_v29 = vmul.f32 %v567_v14, %v277_v22 }
  0x48   : > { %v285_v34 = vadd.f32 %v480_v23, %v278_v27  ;;  %v293_v35 = vadd.f32 %v481_v24, %v286_v28  ;;  %v301_v36 = vadd.f32 %v482_v25, %v294_v29  ;;  %v280_v37 = vsel %vm279_vm0, %v278_v27, 0.0 }
  0x49   : > { %v304_v39 = vadd.f32 %v303_v26, %v280_v37  ;;  %v288_v40 = vsel %vm287_vm1, %v286_v28, 0.0  ;;  %v296_v41 = vsel %vm295_vm2, %v294_v29, 0.0 }
  0x4a   : > { %v314_v43 = vadd.f32 %v483_v31, %v288_v40  ;;  %v320_v44 = vadd.f32 %v485_v32, %v296_v41  ;;  %v326_v45 = vadd.f32 %v487_v33, %v285_v34  ;;  %v332_v46 = vadd.f32 %v489_v38, %v293_v35 }
  0x4b   : > { %309 = vst.msk [vmem:[%s784_s5] ss:$8 sm:$0x3] %vm792_vm3, %v304_v39  ;;  %v338_v47 = vadd.f32 %v491_v42, %v301_v36 }
  0x4c   : > { %484 = vst.msk [vmem:[%s784_s5 + $0x1] ss:$8 sm:$0x3] %vm792_vm3, %v314_v43 }
  0x4d   : > { %486 = vst.msk [vmem:[%s784_s5 + $0x2] ss:$8 sm:$0x3] %vm792_vm3, %v320_v44 }
  0x4e   : > { %488 = vst.msk [vmem:[%s784_s5 + $0x3] ss:$8 sm:$0x3] %vm792_vm3, %v326_v45 }
  0x4f   : > { %490 = vst.msk [vmem:[%s784_s5 + $0x4] ss:$8 sm:$0x3] %vm792_vm3, %v332_v46 }
  0x50   : > { %492 = vst.msk [vmem:[%s784_s5 + $0x5] ss:$8 sm:$0x3] %vm792_vm3, %v338_v47 }
  0x51 PF: > { %s18_s14 = sadd.s32 1, %s684_s14   ;;  %s847_s9 = smov %s668_s10 }
  0x52   : > { %p15_p0 = scmp.ge.s32.totalorder %s18_s14, 4   ;;  %s848_s10 = smov %s672_s11 }
  0x53   : > { %s849_s11 = smov %s749_s20  ;;  %s850_s12 = smov %s680_s13 }
  0x54   : > { %s851_s13 = smov %s853_s16  ;;  %17 = sbr.rel (!%p15_p0) target bundleno = 6 (0x6), region = 92 }
  0x59   :  { %370 = vsyncpa [#allocation3], 1 }
  0x5a   :  { %372 = vsyncpa [#allocation3 + $0x1], 1 }
  0x5b   :  { %373 = vsyncpa [#allocation5], 1 }
  0x5c   :  { %375 = vsyncpa [#allocation5 + $0x1], 1 }

</bundles_post_ra>
